<compile_context>
chip_gen: v5e
topology: v5e:2x2
jax: 0.10.0
libtpu: 0.0.40
codegen_flags: <defaults>
</compile_context>

<pallas_src>
import functools

import jax
import jax.numpy as jnp
from jax.experimental import pallas as pl
from jax.experimental.pallas import tpu as pltpu


def _patch_merge_kernel(x_ref, w_ref, b_ref, o_ref, *, eps):
    """One tile: fused 2x2 patch gather + LayerNorm(4C) + Linear(4C -> 2C).

    x_ref : (th, 2, W2, 2C)  tile of the (N*H2, 2, W2, 2C) view of x.
            axis 1 = row offset r of the 2x2 patch; the last dim already packs
            (col offset, channel), so lane layout never changes in-kernel.
    w_ref : (4C, C2) bf16    reduction weight with LayerNorm gamma folded in.
    b_ref : (1, C2)  f32     beta @ W (folded LayerNorm shift).
    o_ref : (th, W2, C2)
    """
    x = x_ref[...].astype(jnp.float32)              # (th, 2, W2, 2C)
    th, _, w2, c2c = x.shape
    rows = th * w2
    c4 = 2 * c2c

    # 4C positions [0, 2C) = [x0 | x1] (r=0), [2C, 4C) = [x2 | x3] (r=1).
    top = x[:, 0].reshape(rows, c2c)
    bot = x[:, 1].reshape(rows, c2c)

    # LayerNorm statistics over the full 4C vector (biased var, like nn.LayerNorm).
    mean = (jnp.sum(top, axis=-1, keepdims=True)
            + jnp.sum(bot, axis=-1, keepdims=True)) * (1.0 / c4)
    dt = top - mean
    db = bot - mean
    var = (jnp.sum(dt * dt, axis=-1, keepdims=True)
           + jnp.sum(db * db, axis=-1, keepdims=True)) * (1.0 / c4)
    inv = jax.lax.rsqrt(var + eps)

    w = w_ref[...]                                   # (4C, C2), bf16
    tn = (dt * inv).astype(w.dtype)
    bn = (db * inv).astype(w.dtype)

    # concat([top, bot], -1) @ W  ==  top @ W[:2C] + bot @ W[2C:]
    z = jnp.dot(tn, w[:c2c, :], preferred_element_type=jnp.float32)
    z = z + jnp.dot(bn, w[c2c:, :], preferred_element_type=jnp.float32)
    z = z + b_ref[...].astype(jnp.float32)           # folded beta @ W

    o_ref[...] = z.reshape(th, w2, -1).astype(o_ref.dtype)


def simple_patch_merging(x, gamma, beta, w_red, *, eps=1e-5,
                         matmul_dtype=jnp.bfloat16):
    """Forward pass of SimplePatchMerging.

    x: (N, H, W, C); gamma, beta: (4C,); w_red: (4C, 2C) (= torch weight.T).
    returns: (N, ceil(H/2), ceil(W/2), 2C), dtype of x.
    """
    N, H, W, C = x.shape
    if (H % 2) or (W % 2):                           # F.pad(x, (0,0, 0,W%2, 0,H%2))
        x = jnp.pad(x, ((0, 0), (0, H % 2), (0, W % 2), (0, 0)))
    Hp, Wp = x.shape[1], x.shape[2]
    H2, W2 = Hp // 2, Wp // 2
    C2in = 2 * C
    C4 = 4 * C
    C2 = w_red.shape[1]
    M2 = N * H2

    # FREE reshape (contiguous dim merges only): (N, Hp, Wp, C) -> (M2, 2, W2, 2C).
    xr = x.reshape(M2, 2, W2, C2in)

    # Fold LayerNorm affine into the reduction weight / bias (tiny precompute).
    w_f = (gamma.astype(jnp.float32)[:, None]
           * w_red.astype(jnp.float32)).astype(matmul_dtype)        # (4C, C2)
    b_f = (beta.astype(jnp.float32) @ w_red.astype(jnp.float32)).reshape(1, C2)

    # Tile the row-pair axis.  Keep the in-kernel leading-dim reshape trivial
    # (W2 % 8 == 0), otherwise fall back to th = 1 (reshape is a pure squeeze).
    if W2 % 8 == 0:
        target_rows = 1024                           # amortize ~0.35us/step overhead
        th = max(1, min(M2, target_rows // W2))
        per_line_bytes = 2 * W2 * C2in * jnp.dtype(x.dtype).itemsize
        max_in_bytes = 3 * 1024 * 1024               # safe under v5e's 16MiB scoped VMEM
        th = max(1, min(th, max_in_bytes // max(per_line_bytes, 1)))
        if M2 >= 2:                                  # >=2 grid steps for v7x's 2 TCs
            th = min(th, -(-M2 // 2))
    else:
        th = 1

    grid = (pl.cdiv(M2, th),)                        # partial tail block is masked

    out = pl.pallas_call(
        functools.partial(_patch_merge_kernel, eps=eps),
        out_shape=jax.ShapeDtypeStruct((M2, W2, C2), x.dtype),
        grid=grid,
        in_specs=[
            pl.BlockSpec((th, 2, W2, C2in), lambda i: (i, 0, 0, 0)),  # x row-pair tile
            pl.BlockSpec((C4, C2), lambda i: (0, 0)),                 # folded weight (resident)
            pl.BlockSpec((1, C2), lambda i: (0, 0)),                  # folded bias  (resident)
        ],
        out_specs=pl.BlockSpec((th, W2, C2), lambda i: (i, 0, 0)),
        compiler_params=pltpu.CompilerParams(
            dimension_semantics=("parallel",)),
    )(xr, w_f, b_f)

    return out.reshape(N, H2, W2, C2)


def _reference(x, gamma, beta, w_red, eps=1e-5):
    N, H, W, C = x.shape
    x = jnp.pad(x, ((0, 0), (0, H % 2), (0, W % 2), (0, 0)))
    x0 = x[:, 0::2, 0::2]
    x1 = x[:, 0::2, 1::2]
    x2 = x[:, 1::2, 0::2]
    x3 = x[:, 1::2, 1::2]
    xc = jnp.concatenate([x0, x1, x2, x3], axis=-1).astype(jnp.float32)
    mean = jnp.mean(xc, axis=-1, keepdims=True)
    var = jnp.mean((xc - mean) ** 2, axis=-1, keepdims=True)
    xn = (xc - mean) / jnp.sqrt(var + eps)
    y = xn * gamma + beta
    return jnp.einsum("nhwc,cd->nhwd", y, w_red)


if __name__ == "__main__":
    key = jax.random.PRNGKey(0)
    k_x, k_g, k_b, k_w = jax.random.split(key, 4)

    N, H, W, C = 2, 16, 16, 4                        # dim=4 -> 4*dim=16, 2*dim=8
    x = jax.random.normal(k_x, (N, H, W, C), dtype=jnp.float32)

    gamma = 1.0 + 0.1 * jax.random.normal(k_g, (4 * C,), dtype=jnp.float32)
    beta = 0.1 * jax.random.normal(k_b, (4 * C,), dtype=jnp.float32)
    # nn.Linear(4*dim, 2*dim, bias=False).weight is (2*dim, 4*dim); stored
    # pre-transposed as (4*dim, 2*dim) for y @ W.
    w_red = (jax.random.normal(k_w, (4 * C, 2 * C), dtype=jnp.float32)
             * (1.0 / jnp.sqrt(4.0 * C)))

    out = jax.block_until_ready(simple_patch_merging(x, gamma, beta, w_red))
    ref = _reference(x, gamma, beta, w_red)

    assert out.shape == (N, H // 2, W // 2, 2 * C), out.shape
    max_err = float(jnp.max(jnp.abs(out - ref)))
    scale = float(jnp.max(jnp.abs(ref))) + 1e-6
    # bf16 MXU path vs. f32 reference: expect ~1e-3 relative error.
    assert max_err / scale < 2e-2 and max_err < 5e-2, (max_err, scale)

    print("KERNEL_OK")
</pallas_src>

<mosaic_0001>
module attributes {stable_mosaic.version = 11 : i64} {
  func.func @_patch_merge_kernel(%arg0: i32, %arg1: memref<8x2x8x8xf32, #tpu.memory_space<vmem>>, %arg2: memref<16x8xbf16, #tpu.memory_space<vmem>>, %arg3: memref<1x8xf32, #tpu.memory_space<vmem>>, %arg4: memref<8x8x8xf32, #tpu.memory_space<vmem>>) attributes {dimension_semantics = [#tpu.dimension_semantics<parallel>], iteration_bounds = array<i64: 2>, scalar_prefetch = 0 : i64, scratch_operands = 0 : i64, tpu.core_type = #tpu.core_type<tc>, window_params = [{transform_indices = @transform_0, window_bounds = array<i64: 8, 2, 8, 8>}, {pipeline_mode = #tpu.pipeline_mode<synchronous>, transform_indices = @transform_1, window_bounds = array<i64: 16, 8>}, {pipeline_mode = #tpu.pipeline_mode<synchronous>, transform_indices = @transform_2, window_bounds = array<i64: 1, 8>}, {transform_indices = @transform_3, window_bounds = array<i64: 8, 8, 8>}]} {
    %c0 = arith.constant 0 : index
    %c0_0 = arith.constant 0 : index
    %c0_1 = arith.constant 0 : index
    %c0_2 = arith.constant 0 : index
    %0 = vector.load %arg1[%c0, %c0_0, %c0_1, %c0_2] : memref<8x2x8x8xf32, #tpu.memory_space<vmem>>, vector<8x2x8x8xf32>
    %1 = vector.extract_strided_slice %0 {offsets = [0, 0, 0, 0], sizes = [8, 1, 8, 8], strides = [1, 1, 1, 1]} : vector<8x2x8x8xf32> to vector<8x1x8x8xf32>
    %2 = vector.shape_cast %1 : vector<8x1x8x8xf32> to vector<8x8x8xf32>
    %3 = vector.shape_cast %2 : vector<8x8x8xf32> to vector<64x8xf32>
    %4 = vector.extract_strided_slice %0 {offsets = [0, 1, 0, 0], sizes = [8, 1, 8, 8], strides = [1, 1, 1, 1]} : vector<8x2x8x8xf32> to vector<8x1x8x8xf32>
    %5 = vector.shape_cast %4 : vector<8x1x8x8xf32> to vector<8x8x8xf32>
    %6 = vector.shape_cast %5 : vector<8x8x8xf32> to vector<64x8xf32>
    %cst = arith.constant dense<0.000000e+00> : vector<64xf32>
    %7 = vector.multi_reduction <add>, %3, %cst [1] : vector<64x8xf32> to vector<64xf32>
    %8 = vector.shape_cast %7 : vector<64xf32> to vector<64x1xf32>
    %cst_3 = arith.constant dense<0.000000e+00> : vector<64xf32>
    %9 = vector.multi_reduction <add>, %6, %cst_3 [1] : vector<64x8xf32> to vector<64xf32>
    %10 = vector.shape_cast %9 : vector<64xf32> to vector<64x1xf32>
    %11 = arith.addf %8, %10 : vector<64x1xf32>
    %cst_4 = arith.constant 6.250000e-02 : f32
    %12 = vector.broadcast %cst_4 : f32 to vector<64x1xf32>
    %13 = arith.mulf %11, %12 : vector<64x1xf32>
    %14 = vector.broadcast %13 : vector<64x1xf32> to vector<64x8xf32>
    %15 = arith.subf %3, %14 : vector<64x8xf32>
    %16 = vector.broadcast %13 : vector<64x1xf32> to vector<64x8xf32>
    %17 = arith.subf %6, %16 : vector<64x8xf32>
    %18 = arith.mulf %15, %15 : vector<64x8xf32>
    %cst_5 = arith.constant dense<0.000000e+00> : vector<64xf32>
    %19 = vector.multi_reduction <add>, %18, %cst_5 [1] : vector<64x8xf32> to vector<64xf32>
    %20 = vector.shape_cast %19 : vector<64xf32> to vector<64x1xf32>
    %21 = arith.mulf %17, %17 : vector<64x8xf32>
    %cst_6 = arith.constant dense<0.000000e+00> : vector<64xf32>
    %22 = vector.multi_reduction <add>, %21, %cst_6 [1] : vector<64x8xf32> to vector<64xf32>
    %23 = vector.shape_cast %22 : vector<64xf32> to vector<64x1xf32>
    %24 = arith.addf %20, %23 : vector<64x1xf32>
    %cst_7 = arith.constant 6.250000e-02 : f32
    %25 = vector.broadcast %cst_7 : f32 to vector<64x1xf32>
    %26 = arith.mulf %24, %25 : vector<64x1xf32>
    %cst_8 = arith.constant 9.99999974E-6 : f32
    %27 = vector.broadcast %cst_8 : f32 to vector<64x1xf32>
    %28 = arith.addf %26, %27 : vector<64x1xf32>
    %29 = math.rsqrt %28 : vector<64x1xf32>
    %c0_9 = arith.constant 0 : index
    %c0_10 = arith.constant 0 : index
    %30 = vector.load %arg2[%c0_9, %c0_10] : memref<16x8xbf16, #tpu.memory_space<vmem>>, vector<16x8xbf16>
    %31 = vector.broadcast %29 : vector<64x1xf32> to vector<64x8xf32>
    %32 = arith.mulf %15, %31 : vector<64x8xf32>
    %33 = arith.truncf %32 : vector<64x8xf32> to vector<64x8xbf16>
    %34 = vector.broadcast %29 : vector<64x1xf32> to vector<64x8xf32>
    %35 = arith.mulf %17, %34 : vector<64x8xf32>
    %36 = arith.truncf %35 : vector<64x8xf32> to vector<64x8xbf16>
    %37 = vector.extract_strided_slice %30 {offsets = [0, 0], sizes = [8, 8], strides = [1, 1]} : vector<16x8xbf16> to vector<8x8xbf16>
    %cst_11 = arith.constant dense<0.000000e+00> : vector<64x8xf32>
    %38 = tpu.matmul %33, %37, %cst_11 {dimension_numbers = #tpu.dot_dimension_numbers<[1], [0], [0], [1], [0, 0, 1, 1], [], []>} : vector<64x8xbf16>, vector<8x8xbf16>, vector<64x8xf32> -> vector<64x8xf32>
    %39 = vector.extract_strided_slice %30 {offsets = [8, 0], sizes = [8, 8], strides = [1, 1]} : vector<16x8xbf16> to vector<8x8xbf16>
    %cst_12 = arith.constant dense<0.000000e+00> : vector<64x8xf32>
    %40 = tpu.matmul %36, %39, %cst_12 {dimension_numbers = #tpu.dot_dimension_numbers<[1], [0], [0], [1], [0, 0, 1, 1], [], []>} : vector<64x8xbf16>, vector<8x8xbf16>, vector<64x8xf32> -> vector<64x8xf32>
    %41 = arith.addf %38, %40 : vector<64x8xf32>
    %c0_13 = arith.constant 0 : index
    %c0_14 = arith.constant 0 : index
    %42 = vector.load %arg3[%c0_13, %c0_14] : memref<1x8xf32, #tpu.memory_space<vmem>>, vector<1x8xf32>
    %43 = vector.broadcast %42 : vector<1x8xf32> to vector<64x8xf32>
    %44 = arith.addf %41, %43 : vector<64x8xf32>
    %45 = vector.shape_cast %44 : vector<64x8xf32> to vector<8x8x8xf32>
    %c0_15 = arith.constant 0 : index
    %c0_16 = arith.constant 0 : index
    %c0_17 = arith.constant 0 : index
    %46 = vector.load %arg4[%c0_15, %c0_16, %c0_17] : memref<8x8x8xf32, #tpu.memory_space<vmem>>, vector<8x8x8xf32>
    tpu.vector_store %arg4[%c0_15, %c0_16, %c0_17], %45 {strides = array<i32>} : memref<8x8x8xf32, #tpu.memory_space<vmem>>, vector<8x8x8xf32>,
    return
  }
  func.func @transform_0(%arg0: i32) -> (i32, i32, i32, i32) {
    %c0_i32 = arith.constant 0 : i32
    %c0_i32_0 = arith.constant 0 : i32
    %c0_i32_1 = arith.constant 0 : i32
    %c0_i32_2 = arith.constant 0 : i32
    return %arg0, %c0_i32, %c0_i32_0, %c0_i32_1 : i32, i32, i32, i32
  }
  func.func @transform_1(%arg0: i32) -> (i32, i32) {
    %c0_i32 = arith.constant 0 : i32
    %c0_i32_0 = arith.constant 0 : i32
    %c0_i32_1 = arith.constant 0 : i32
    return %c0_i32, %c0_i32_0 : i32, i32
  }
  func.func @transform_2(%arg0: i32) -> (i32, i32) {
    %c0_i32 = arith.constant 0 : i32
    %c0_i32_0 = arith.constant 0 : i32
    %c0_i32_1 = arith.constant 0 : i32
    return %c0_i32, %c0_i32_0 : i32, i32
  }
  func.func @transform_3(%arg0: i32) -> (i32, i32, i32) {
    %c0_i32 = arith.constant 0 : i32
    %c0_i32_0 = arith.constant 0 : i32
    %c0_i32_1 = arith.constant 0 : i32
    return %arg0, %c0_i32, %c0_i32_0 : i32, i32, i32
  }
}

</mosaic_0001>

<bundles_post_ra>
// kernel: tpu_custom_call.1
= control target key start
LH: loop header
LB: loop body
LE: loop exit
PB: predicated region body
PF: predicated region fallthrough
CT: control target
= control target key end

     0   :  { %s710_s12 = smov 0   ;;  %s949_s0 = inlined_call_operand.vmem [shape: f32[16,2,8,8], index: 0, kind: input, shape index: {}]   ;;  %s950_s1 = inlined_call_operand.vmem [shape: bf16[16,8], index: 1, kind: input, shape index: {}]   ;;  %s951_s2 = inlined_call_operand.vmem [shape: f32[1,8], index: 2, kind: input, shape index: {}]   ;;  %s952_s3 = inlined_call_operand.vmem [shape: f32[16,8,8], index: 3, kind: output, shape index: {}]  }
   0x1 LB: > { %s634_s13 = sadd.s32 4294967295, %s688_s12   ;;  %p638_p0 = scmp.ge.s32.totalorder %s688_s12, 1  ;;  %s688_s12 = sphi %s710_s12, %s13_s12  }
   0x2   : > { %p139_p1 = scmp.lt.s32.totalorder %s688_s12, 3 }
   0x4   : > { %p140_p2 = pnand %p638_p0, %p139_p1 }
   0x5   : > { %s639_s14 = sshll.u32 (!%p140_p2), %s634_s13, 3 }
   0x6   : > { %143 = sbr.rel (%p140_p2) target bundleno = 466 (0x1d2), region = 32  ;;  %p165_p3 = scmp.lt.s32.totalorder (!%p140_p2), %s639_s14, 15 }
   0xb   : > { %s954_s14 = smov (!%p165_p3, %s639_s14), 15  ;;  %vm194_vm0 = vcmask 64512   ;;  %vm481_vm1 = vcmask 1043456  }
   0xc   : > { %s654_s15 = sshll.u32 %s954_s14, 4  ;;  %s643_s23 = sshll.u32 %s954_s14, 3 }
   0xd   : > { %s724_s18 = scalar_lea.vmem %s949_s0, %s654_s15  ;;  %s928_s28 = scalar_lea.vmem %s952_s3, %s643_s23 }
   0xe   : > { %v187_v0 = vld [vmem:[%s724_s18 + $0x48] sm:$0xff]  ;;  %v186_v1 = vld [vmem:[%s724_s18 + $0x40] sm:$0xff]  ;;  %v189_v6 = vld [vmem:[%s724_s18 + $0x58] sm:$0xff] }
   0xf   : > { %v729_v2 = vld [vmem:[%s724_s18] sm:$0xff]  ;;  %v231_v3 = vsel %vm194_vm0, %v187_v0, 0.0  ;;  %v207_v4 = vsel %vm194_vm0, %v186_v1, 0.0  ;;  %v188_v7 = vld [vmem:[%s724_s18 + $0x50] sm:$0xff]  ;;  %v234_v9 = vsel %vm194_vm0, %v189_v6, 0.0  ;;  %v745_v12 = vld [vmem:[%s724_s18 + $0x18] sm:$0xff] }
  0x10   : > { %v195_v5 = vsel %vm194_vm0, %v729_v2, 0.0  ;;  %232 = vadd.xlane.f32.xlu1 %v231_v3  ;;  %208 = vadd.xlane.f32.xlu0 %v207_v4  ;;  %v738_v8 = vld [vmem:[%s724_s18 + $0x10] sm:$0xff]  ;;  %v210_v10 = vsel %vm194_vm0, %v188_v7, 0.0  ;;  %v748_v13 = vld [vmem:[%s724_s18 + $0x8] sm:$0xff]  ;;  %v751_v14 = vld [vmem:[%s724_s18 + $0x60] sm:$0xff]  ;;  %v222_v15 = vsel %vm194_vm0, %v745_v12, 0.0 }
  0x11   : > { %196 = vadd.xlane.f32.xlu2 %v195_v5  ;;  %v198_v11 = vsel %vm194_vm0, %v738_v8, 0.0  ;;  %v219_v16 = vsel %vm194_vm0, %v748_v13, 0.0  ;;  %v213_v17 = vsel %vm194_vm0, %v751_v14, 0.0  ;;  %v760_v18 = vld [vmem:[%s724_s18 + $0x68] sm:$0xff]  ;;  %v763_v19 = vld [vmem:[%s724_s18 + $0x70] sm:$0xff]  ;;  %v766_v20 = vld [vmem:[%s724_s18 + $0x78] sm:$0xff] }
  0x12   : > { %v237_v21 = vsel %vm194_vm0, %v760_v18, 0.0  ;;  %v216_v22 = vsel %vm194_vm0, %v763_v19, 0.0  ;;  %v240_v23 = vsel %vm194_vm0, %v766_v20, 0.0  ;;  %v775_v24 = vld [vmem:[%s724_s18 + $0x20] sm:$0xff]  ;;  %v778_v25 = vld [vmem:[%s724_s18 + $0x30] sm:$0xff]  ;;  %v781_v26 = vld [vmem:[%s724_s18 + $0x28] sm:$0xff] }
  0x13   : > { %v201_v27 = vsel %vm194_vm0, %v775_v24, 0.0  ;;  %v204_v28 = vsel %vm194_vm0, %v778_v25, 0.0  ;;  %v225_v29 = vsel %vm194_vm0, %v781_v26, 0.0  ;;  %v790_v30 = vld [vmem:[%s724_s18 + $0x38] sm:$0xff] }
  0x14   : > { %v228_v31 = vsel %vm194_vm0, %v790_v30, 0.0 }
  0x18   : > { %235 = vadd.xlane.f32.xlu1 %v234_v9  ;;  %211 = vadd.xlane.f32.xlu0 %v210_v10 }
  0x19   : > { %199 = vadd.xlane.f32.xlu2 %v198_v11 }
  0x20   : > { %223 = vadd.xlane.f32.xlu1 %v222_v15  ;;  %220 = vadd.xlane.f32.xlu0 %v219_v16 }
  0x21   : > { %214 = vadd.xlane.f32.xlu2 %v213_v17 }
  0x28   : > { %238 = vadd.xlane.f32.xlu1 %v237_v21  ;;  %217 = vadd.xlane.f32.xlu0 %v216_v22 }
  0x29   : > { %241 = vadd.xlane.f32.xlu2 %v240_v23 }
  0x30   : > { %202 = vadd.xlane.f32.xlu0 %v201_v27  ;;  %205 = vadd.xlane.f32.xlu1 %v204_v28 }
  0x31   : > { %226 = vadd.xlane.f32.xlu2 %v225_v29 }
  0x38   : > { %229 = vadd.xlane.f32.xlu0 %v228_v31 }
  0x83   : > { %v233_v32 = vpop.xlane.xlu1 %232  ;;  %v209_v33 = vpop.xlane.xlu0 %208 }
  0x84   : > { %v247_v34 = vadd.f32 %v233_v32, %v209_v33  ;;  %v197_v35 = vpop.xlane.xlu2 %196 }
  0x86   : > { %v255_v36 = vmul.f32 0.0625, %v247_v34 }
  0x88   : > { %v794_v37 = vsub.f32 %v186_v1, %v255_v36  ;;  %v796_v38 = vsub.f32 %v187_v0, %v255_v36 }
  0x8a   : > { %v279_v39 = vmul.f32 %v794_v37, %v794_v37  ;;  %v311_v40 = vmul.f32 %v796_v38, %v796_v38 }
  0x8b   : > { %v236_v41 = vpop.xlane.xlu1 %235  ;;  %v212_v42 = vpop.xlane.xlu0 %211 }
  0x8c   : > { %v248_v43 = vadd.f32 %v236_v41, %v212_v42  ;;  %v200_v44 = vpop.xlane.xlu2 %199  ;;  %v295_v45 = vsel %vm194_vm0, %v279_v39, 0.0  ;;  %v327_v46 = vsel %vm194_vm0, %v311_v40, 0.0 }
  0x8d   : > { %296 = vadd.xlane.f32.xlu1 %v295_v45  ;;  %328 = vadd.xlane.f32.xlu0 %v327_v46 }
  0x8e   : > { %v256_v47 = vmul.f32 0.0625, %v248_v43 }
  0x90   : > { %v804_v48 = vsub.f32 %v188_v7, %v256_v47  ;;  %v806_v49 = vsub.f32 %v189_v6, %v256_v47 }
  0x92   : > { %v312_v50 = vmul.f32 %v806_v49, %v806_v49  ;;  %v280_v51 = vmul.f32 %v804_v48, %v804_v48 }
  0x93   : > { %v224_v52 = vpop.xlane.xlu1 %223  ;;  %v221_v53 = vpop.xlane.xlu0 %220 }
  0x94   : > { %v244_v54 = vadd.f32 %v224_v52, %v200_v44  ;;  %v243_v55 = vadd.f32 %v221_v53, %v197_v35  ;;  %v215_v56 = vpop.xlane.xlu2 %214  ;;  %v330_v57 = vsel %vm194_vm0, %v312_v50, 0.0  ;;  %v298_v58 = vsel %vm194_vm0, %v280_v51, 0.0 }
  0x95   : > { %331 = vadd.xlane.f32.xlu1 %v330_v57  ;;  %299 = vadd.xlane.f32.xlu2 %v298_v58 }
  0x96   : > { %v252_v59 = vmul.f32 0.0625, %v244_v54  ;;  %v251_v60 = vmul.f32 0.0625, %v243_v55  ;;  %v444_v55 = vld [vmem:[%s950_s1 + $0x4] sm:$0xf] }
  0x97   : > { %v483_v57 = vsel %vm481_vm1, %v444_v55, 0 }
  0x98   : > { %v815_v61 = vsub.f32 %v738_v8, %v252_v59  ;;  %v818_v62 = vsub.f32 %v729_v2, %v251_v60  ;;  %v821_v63 = vsub.f32 %v748_v13, %v251_v60  ;;  %v830_v4 = vsub.f32 %v745_v12, %v252_v59  ;;  %655 = vmatpush.bf16.msra.mxu2 %v483_v57 }
  0x99   : > { %492 = vmatpush.bf16.msra.mxu0 %v483_v57 }
  0x9a   : > { %v307_v0 = vmul.f32 %v821_v63, %v821_v63  ;;  %v275_v1 = vmul.f32 %v818_v62, %v818_v62  ;;  %v276_v3 = vmul.f32 %v815_v61, %v815_v61  ;;  %v308_v12 = vmul.f32 %v830_v4, %v830_v4 }
  0x9b   : > { %v239_v5 = vpop.xlane.xlu1 %238  ;;  %v218_v6 = vpop.xlane.xlu0 %217 }
  0x9c   : > { %v249_v7 = vadd.f32 %v239_v5, %v215_v56  ;;  %v242_v2 = vpop.xlane.xlu2 %241  ;;  %v315_v8 = vsel %vm194_vm0, %v307_v0, 0.0  ;;  %v283_v9 = vsel %vm194_vm0, %v275_v1, 0.0  ;;  %v286_v10 = vsel %vm194_vm0, %v276_v3, 0.0  ;;  %v443_v56 = vld [vmem:[%s950_s1] sm:$0xf] }
  0x9d   : > { %v250_v11 = vadd.f32 %v242_v2, %v218_v6  ;;  %316 = vadd.xlane.f32.xlu1 %v315_v8  ;;  %284 = vadd.xlane.f32.xlu2 %v283_v9  ;;  %v527_v58 = vsel %vm481_vm1, %v443_v56, 0 }
  0x9e   : > { %v257_v13 = vmul.f32 0.0625, %v249_v7  ;;  %287 = vadd.xlane.f32.xlu0 %v286_v10  ;;  %656 = vmatpush.bf16.msra.mxu3 %v527_v58 }
  0x9f   : > { %v258_v15 = vmul.f32 0.0625, %v250_v11  ;;  %536 = vmatpush.bf16.msra.mxu1 %v527_v58 }
  0xa0   : > { %v836_v16 = vsub.f32 %v751_v14, %v257_v13  ;;  %v848_v27 = vsub.f32 %v760_v18, %v257_v13  ;;  %v318_v14 = vsel %vm194_vm0, %v308_v12, 0.0 }
  0xa1   : > { %v841_v17 = vsub.f32 %v763_v19, %v258_v15  ;;  %v853_v31 = vsub.f32 %v766_v20, %v258_v15 }
  0xa2   : > { %v281_v21 = vmul.f32 %v836_v16, %v836_v16  ;;  %v313_v34 = vmul.f32 %v848_v27, %v848_v27 }
  0xa3   : > { %v203_v22 = vpop.xlane.xlu0 %202  ;;  %v282_v23 = vmul.f32 %v841_v17, %v841_v17  ;;  %v206_v35 = vpop.xlane.xlu1 %205  ;;  %v314_v36 = vmul.f32 %v853_v31, %v853_v31 }
  0xa4   : > { %v227_v28 = vpop.xlane.xlu2 %226  ;;  %v301_v29 = vsel %vm194_vm0, %v281_v21, 0.0  ;;  %v333_v41 = vsel %vm194_vm0, %v313_v34, 0.0 }
  0xa5   : > { %v245_v19 = vadd.f32 %v227_v28, %v203_v22  ;;  %319 = vadd.xlane.f32.xlu2 %v318_v14  ;;  %v304_v32 = vsel %vm194_vm0, %v282_v23, 0.0  ;;  %v336_v43 = vsel %vm194_vm0, %v314_v36, 0.0 }
  0xa6   : > { %302 = vadd.xlane.f32.xlu0 %v301_v29  ;;  %305 = vadd.xlane.f32.xlu1 %v304_v32 }
  0xa7   : > { %v253_v33 = vmul.f32 0.0625, %v245_v19 }
  0xa9   : > { %v859_v18 = vsub.f32 %v775_v24, %v253_v33  ;;  %v867_v42 = vsub.f32 %v781_v26, %v253_v33 }
  0xab   : > { %v230_v39 = vpop.xlane.xlu0 %229  ;;  %v277_v20 = vmul.f32 %v859_v18, %v859_v18  ;;  %v309_v47 = vmul.f32 %v867_v42, %v867_v42 }
  0xac   : > { %v246_v40 = vadd.f32 %v230_v39, %v206_v35 }
  0xad   : > { %334 = vadd.xlane.f32.xlu2 %v333_v41  ;;  %v289_v24 = vsel %vm194_vm0, %v277_v20, 0.0 }
  0xae   : > { %v254_v44 = vmul.f32 0.0625, %v246_v40  ;;  %337 = vadd.xlane.f32.xlu0 %v336_v43  ;;  %290 = vadd.xlane.f32.xlu1 %v289_v24 }
  0xb0   : > { %v872_v45 = vsub.f32 %v778_v25, %v254_v44  ;;  %v875_v46 = vsub.f32 %v790_v30, %v254_v44  ;;  %v321_v25 = vsel %vm194_vm0, %v309_v47, 0.0 }
  0xb2   : > { %v278_v26 = vmul.f32 %v872_v45, %v872_v45  ;;  %v310_v50 = vmul.f32 %v875_v46, %v875_v46 }
  0xb4   : > { %v292_v51 = vsel %vm194_vm0, %v278_v26, 0.0  ;;  %v324_v52 = vsel %vm194_vm0, %v310_v50, 0.0 }
  0xb5   : > { %293 = vadd.xlane.f32.xlu2 %v292_v51 }
  0xb6   : > { %322 = vadd.xlane.f32.xlu0 %v321_v25  ;;  %325 = vadd.xlane.f32.xlu1 %v324_v52 }
 0x100   : > { %v297_v30 = vpop.xlane.xlu1 %296  ;;  %v329_v53 = vpop.xlane.xlu0 %328 }
 0x101   : > { %v343_v54 = vadd.f32 %v329_v53, %v297_v30 }
 0x103   : > { %v351_v59 = vmul.f32 0.0625, %v343_v54 }
 0x105   : > { %v359_v60 = vadd.f32 1e-05, %v351_v59 }
 0x107   : > { %666 = vrsqrt.f32 %v359_v60  ;;  %vm409_vm3 = vweird.f32 %v359_v60 }
 0x108   : > { %v332_v0 = vpop.xlane.xlu1 %331  ;;  %v300_v1 = vpop.xlane.xlu2 %299 }
 0x109   : > { %v344_v3 = vadd.f32 %v332_v0, %v300_v1 }
 0x10b   : > { %v352_v5 = vmul.f32 0.0625, %v344_v3 }
 0x10d   : > { %v667_v6 = vpop.eup %666  ;;  %v360_v7 = vadd.f32 1e-05, %v352_v5 }
 0x10e   : > { %v404_v2 = vmul.f32 %v667_v6, %v359_v60  ;;  %vm410_vm2 = vweird.f32 %v667_v6 }
 0x10f   : > { %668 = vrsqrt.f32 %v360_v7  ;;  %vm411_vm4 = vmor %vm409_vm3, %vm410_vm2  ;;  %vm419_vm6 = vweird.f32 %v360_v7 }
 0x110   : > { %v405_v8 = vmul.f32 %v667_v6, %v404_v2  ;;  %v317_v9 = vpop.xlane.xlu1 %316  ;;  %v285_v10 = vpop.xlane.xlu2 %284 }
 0x111   : > { %v288_v11 = vpop.xlane.xlu0 %287  ;;  %v339_v13 = vadd.f32 %v317_v9, %v285_v10 }
 0x112   : > { %v406_v15 = vmul.f32 0.5, %v405_v8 }
 0x113   : > { %v347_v12 = vmul.f32 0.0625, %v339_v13 }
 0x114   : > { %v407_v22 = vsub.f32 1.5, %v406_v15 }
 0x115   : > { %v669_v21 = vpop.eup %668  ;;  %v892_v23 = vadd.f32 1e-05, %v347_v12 }
 0x116   : > { %v414_v28 = vmul.f32 %v669_v21, %v360_v7  ;;  %v408_v19 = vmul.f32 %v667_v6, %v407_v22  ;;  %vm420_vm5 = vweird.f32 %v669_v21 }
 0x117   : > { %670 = vrsqrt.f32 %v892_v23  ;;  %vm421_vm7 = vmor %vm419_vm6, %vm420_vm5  ;;  %vm369_vm9 = vweird.f32 %v892_v23 }
 0x118   : > { %v415_v14 = vmul.f32 %v669_v21, %v414_v28  ;;  %v320_v29 = vpop.xlane.xlu2 %319  ;;  %v412_v41 = vsel %vm411_vm4, %v667_v6, %v408_v19 }
 0x119   : > { %v303_v32 = vpop.xlane.xlu0 %302  ;;  %v306_v33 = vpop.xlane.xlu1 %305  ;;  %v340_v34 = vadd.f32 %v320_v29, %v288_v11  ;;  %v461_v50 = vmul.f32 %v412_v41, %v796_v38  ;;  %v449_v53 = vmul.f32 %v412_v41, %v794_v37 }
 0x11a   : > { %v416_v35 = vmul.f32 0.5, %v415_v14 }
 0x11b   : > { %v348_v36 = vmul.f32 0.0625, %v340_v34 }
 0x11c   : > { %v417_v39 = vsub.f32 1.5, %v416_v35 }
 0x11d   : > { %v671_v20 = vpop.eup %670  ;;  %v356_v40 = vadd.f32 1e-05, %v348_v36 }
 0x11e   : > { %v418_v43 = vmul.f32 %v669_v21, %v417_v39  ;;  %v364_v24 = vmul.f32 %v671_v20, %v892_v23  ;;  %vm370_vm8 = vweird.f32 %v671_v20 }
 0x11f   : > { %672 = vrsqrt.f32 %v356_v40  ;;  %vm371_vm11 = vmor %vm369_vm9, %vm370_vm8  ;;  %vm379_vm12 = vweird.f32 %v356_v40 }
 0x120   : > { %v365_v44 = vmul.f32 %v671_v20, %v364_v24  ;;  %v335_v47 = vpop.xlane.xlu2 %334  ;;  %v422_v26 = vsel %vm421_vm7, %v669_v21, %v418_v43 }
 0x121   : > { %v338_v51 = vpop.xlane.xlu0 %337  ;;  %v291_v52 = vpop.xlane.xlu1 %290  ;;  %v345_v25 = vadd.f32 %v335_v47, %v303_v32  ;;  %v462_v30 = vmul.f32 %v422_v26, %v806_v49  ;;  %v450_v54 = vmul.f32 %v422_v26, %v804_v48 }
 0x122   : > { %v366_v55 = vmul.f32 0.5, %v365_v44  ;;  %v346_v56 = vadd.f32 %v338_v51, %v306_v33 }
 0x123   : > { %v353_v57 = vmul.f32 0.0625, %v345_v25  ;;  %v467_v58 = vpack.c.bf16 %v462_v30, %v461_v50  ;;  %v455_v59 = vpack.c.bf16 %v450_v54, %v449_v53 }
 0x124   : > { %v354_v60 = vmul.f32 0.0625, %v346_v56  ;;  %v367_v38 = vsub.f32 1.5, %v366_v55 }
 0x125   : > { %v673_v0 = vpop.eup %672  ;;  %v361_v1 = vadd.f32 1e-05, %v353_v57  ;;  %646 = vmatmul.msk.bf16.vlgmr.msra.gmra.mxu2 %vm194_vm0, %v467_v58  ;;  %650 = vmatmul.msk.bf16.vlgmr.msra.gmra.mxu3 %vm194_vm0, %v455_v59 }
 0x126   : > { %v374_v3 = vmul.f32 %v673_v0, %v356_v40  ;;  %v362_v5 = vadd.f32 1e-05, %v354_v60  ;;  %v368_v7 = vmul.f32 %v671_v20, %v367_v38  ;;  %vm380_vm10 = vweird.f32 %v673_v0 }
 0x127   : > { %674 = vrsqrt.f32 %v361_v1  ;;  %vm381_vm13 = vmor %vm379_vm12, %vm380_vm10  ;;  %vm429_vm1 = vweird.f32 %v361_v1 }
 0x128   : > { %v375_v49 = vmul.f32 %v673_v0, %v374_v3  ;;  %676 = vrsqrt.f32 %v362_v5  ;;  %v294_v37 = vpop.xlane.xlu2 %293  ;;  %v372_v14 = vsel %vm371_vm11, %v671_v20, %v368_v7  ;;  %vm439_vm2 = vweird.f32 %v362_v5 }
 0x129   : > { %v323_v48 = vpop.xlane.xlu0 %322  ;;  %v326_v6 = vpop.xlane.xlu1 %325  ;;  %v457_v23 = vmul.f32 %v372_v14, %v821_v63  ;;  %v445_v39 = vmul.f32 %v372_v14, %v818_v62 }
 0x12a   : > { %v376_v2 = vmul.f32 0.5, %v375_v49  ;;  %v341_v8 = vadd.f32 %v323_v48, %v291_v52  ;;  %v342_v9 = vadd.f32 %v326_v6, %v294_v37  ;;  %v665_v48 = vld [vmem:[%s951_s2] ss:$0 sm:$0xff] }
 0x12c   : > { %v377_v10 = vsub.f32 1.5, %v376_v2  ;;  %v349_v11 = vmul.f32 0.0625, %v341_v8  ;;  %v350_v13 = vmul.f32 0.0625, %v342_v9 }
 0x12d   : > { %v675_v15 = vpop.eup %674 }
 0x12e   : > { %v677_v12 = vpop.eup %676  ;;  %v378_v21 = vmul.f32 %v673_v0, %v377_v10  ;;  %v424_v22 = vmul.f32 %v675_v15, %v361_v1  ;;  %v357_v28 = vadd.f32 1e-05, %v349_v11  ;;  %v358_v19 = vadd.f32 1e-05, %v350_v13 }
 0x12f   : > { %v434_v29 = vmul.f32 %v677_v12, %v362_v5  ;;  %vm430_vm14 = vweird.f32 %v675_v15  ;;  %vm440_vm15 = vweird.f32 %v677_v12 }
 0x130   : > { %v425_v32 = vmul.f32 %v675_v15, %v424_v22  ;;  %678 = vrsqrt.f32 %v357_v28  ;;  %v382_v33 = vsel %vm381_vm13, %v673_v0, %v378_v21  ;;  %vm431_vm3 = vmor %vm429_vm1, %vm430_vm14  ;;  %vm389_vm7 = vweird.f32 %v357_v28 }
 0x131   : > { %v435_v34 = vmul.f32 %v677_v12, %v434_v29  ;;  %680 = vrsqrt.f32 %v358_v19  ;;  %v458_v35 = vmul.f32 %v382_v33, %v830_v4  ;;  %v446_v40 = vmul.f32 %v382_v33, %v815_v61  ;;  %vm441_vm4 = vmor %vm439_vm2, %vm440_vm15 }
 0x132   : > { %v426_v36 = vmul.f32 0.5, %v425_v32  ;;  %vm399_vm9 = vweird.f32 %v358_v19 }
 0x133   : > { %v436_v41 = vmul.f32 0.5, %v435_v34  ;;  %v465_v43 = vpack.c.bf16 %v458_v35, %v457_v23  ;;  %v453_v24 = vpack.c.bf16 %v446_v40, %v445_v39 }
 0x134   : > { %v427_v20 = vsub.f32 1.5, %v426_v36 }
 0x135   : > { %v437_v44 = vsub.f32 1.5, %v436_v41  ;;  %644 = vmatmul.msk.bf16.vlgmr.msra.gmra.mxu0 %vm194_vm0, %v465_v43  ;;  %648 = vmatmul.msk.bf16.vlgmr.msra.gmra.mxu1 %vm194_vm0, %v453_v24 }
 0x136   : > { %v679_v47 = vpop.eup %678  ;;  %v428_v26 = vmul.f32 %v675_v15, %v427_v20 }
 0x137   : > { %v681_v63 = vpop.eup %680  ;;  %v438_v4 = vmul.f32 %v677_v12, %v437_v44  ;;  %v384_v62 = vmul.f32 %v679_v47, %v357_v28  ;;  %vm390_vm5 = vweird.f32 %v679_v47 }
 0x138   : > { %v394_v61 = vmul.f32 %v681_v63, %v358_v19  ;;  %v432_v50 = vsel %vm431_vm3, %v675_v15, %v428_v26  ;;  %vm400_vm6 = vweird.f32 %v681_v63  ;;  %vm391_vm8 = vmor %vm389_vm7, %vm390_vm5 }
 0x139   : > { %v385_v51 = vmul.f32 %v679_v47, %v384_v62  ;;  %v442_v52 = vsel %vm441_vm4, %v677_v12, %v438_v4  ;;  %v463_v25 = vmul.f32 %v432_v50, %v848_v27  ;;  %v451_v30 = vmul.f32 %v432_v50, %v836_v16  ;;  %vm401_vm10 = vmor %vm399_vm9, %vm400_vm6 }
 0x13a   : > { %v395_v53 = vmul.f32 %v681_v63, %v394_v61  ;;  %v464_v54 = vmul.f32 %v442_v52, %v853_v31  ;;  %v452_v55 = vmul.f32 %v442_v52, %v841_v17 }
 0x13b   : > { %v386_v56 = vmul.f32 0.5, %v385_v51 }
 0x13c   : > { %v396_v57 = vmul.f32 0.5, %v395_v53  ;;  %v468_v58 = vpack.c.bf16 %v464_v54, %v463_v25  ;;  %v456_v59 = vpack.c.bf16 %v452_v55, %v451_v30 }
 0x13d   : > { %v387_v60 = vsub.f32 1.5, %v386_v56 }
 0x13e   : > { %v397_v0 = vsub.f32 1.5, %v396_v57  ;;  %647 = vmatmul.msk.bf16.gmra.mxu2 %vm194_vm0, %v468_v58  ;;  %651 = vmatmul.msk.bf16.gmra.mxu3 %vm194_vm0, %v456_v59 }
 0x13f   : > { %v388_v27 = vmul.f32 %v679_v47, %v387_v60 }
 0x140   : > { %v398_v16 = vmul.f32 %v681_v63, %v397_v0 }
 0x141   : > { %v392_v17 = vsel %vm391_vm8, %v679_v47, %v388_v27 }
 0x142   : > { %v402_v31 = vsel %vm401_vm10, %v681_v63, %v398_v16  ;;  %v459_v1 = vmul.f32 %v392_v17, %v867_v42  ;;  %v447_v38 = vmul.f32 %v392_v17, %v859_v18 }
 0x143   : > { %v460_v3 = vmul.f32 %v402_v31, %v875_v46  ;;  %v448_v5 = vmul.f32 %v402_v31, %v872_v45 }
 0x145   : > { %v466_v49 = vpack.c.bf16 %v460_v3, %v459_v1  ;;  %v454_v37 = vpack.c.bf16 %v448_v5, %v447_v38 }
 0x147   : > { %645 = vmatmul.msk.bf16.gmra.mxu0 %vm194_vm0, %v466_v49  ;;  %649 = vmatmul.msk.bf16.gmra.mxu1 %vm194_vm0, %v454_v37 }
 0x1a8   : > { %v504_v6 = vpop.f32.mrf.mxu2  ;;  %v548_v7 = vpop.f32.mrf.mxu3 }
 0x1a9   : > { %v549_v42 = vadd.f32 %v548_v7, %v504_v6 }
 0x1ab   : > { %v566_v18 = vadd.f32 %v665_v48, %v549_v42 }
 0x1ad   : > { %574 = vst.msk [vmem:[%s928_s28 + $0x20] sm:$0xff] %vm194_vm0, %v566_v18 }
 0x1b0   : > { %v506_v45 = vpop.f32.mrf.mxu2  ;;  %v550_v46 = vpop.f32.mrf.mxu3 }
 0x1b1   : > { %v551_v2 = vadd.f32 %v550_v46, %v506_v45 }
 0x1b2   : > { %v494_v8 = vpop.f32.mrf.mxu0  ;;  %v538_v10 = vpop.f32.mrf.mxu1 }
 0x1b3   : > { %v567_v9 = vadd.f32 %v665_v48, %v551_v2  ;;  %v539_v11 = vadd.f32 %v538_v10, %v494_v8 }
 0x1b5   : > { %575 = vst.msk [vmem:[%s928_s28 + $0x28] sm:$0xff] %vm194_vm0, %v567_v9  ;;  %v562_v13 = vadd.f32 %v665_v48, %v539_v11 }
 0x1b7   : > { %570 = vst.msk [vmem:[%s928_s28] sm:$0xff] %vm194_vm0, %v562_v13 }
 0x1ba   : > { %v496_v15 = vpop.f32.mrf.mxu0  ;;  %v540_v12 = vpop.f32.mrf.mxu1 }
 0x1bb   : > { %v541_v21 = vadd.f32 %v540_v12, %v496_v15 }
 0x1bd   : > { %v563_v22 = vadd.f32 %v665_v48, %v541_v21 }
 0x1bf   : > { %571 = vst.msk [vmem:[%s928_s28 + $0x8] sm:$0xff] %vm194_vm0, %v563_v22 }
 0x1c1   : > { %v509_v28 = vpop.f32.mrf.mxu2  ;;  %v553_v14 = vpop.f32.mrf.mxu3 }
 0x1c2   : > { %v554_v29 = vadd.f32 %v553_v14, %v509_v28 }
 0x1c4   : > { %v568_v19 = vadd.f32 %v665_v48, %v554_v29  ;;  %v499_v32 = vpop.f32.mrf.mxu0  ;;  %v543_v33 = vpop.f32.mrf.mxu1 }
 0x1c5   : > { %v544_v34 = vadd.f32 %v543_v33, %v499_v32 }
 0x1c6   : > { %576 = vst.msk [vmem:[%s928_s28 + $0x30] sm:$0xff] %vm194_vm0, %v568_v19 }
 0x1c7   : > { %v564_v23 = vadd.f32 %v665_v48, %v544_v34 }
 0x1c9   : > { %572 = vst.msk [vmem:[%s928_s28 + $0x10] sm:$0xff] %vm194_vm0, %v564_v23  ;;  %v511_v35 = vpop.f32.mrf.mxu2  ;;  %v555_v36 = vpop.f32.mrf.mxu3 }
 0x1ca   : > { %v556_v39 = vadd.f32 %v555_v36, %v511_v35 }
 0x1cc   : > { %v569_v40 = vadd.f32 %v665_v48, %v556_v39  ;;  %v501_v41 = vpop.f32.mrf.mxu0  ;;  %v545_v43 = vpop.f32.mrf.mxu1 }
 0x1cd   : > { %v546_v20 = vadd.f32 %v545_v43, %v501_v41 }
 0x1ce   : > { %577 = vst.msk [vmem:[%s928_s28 + $0x38] sm:$0xff] %vm194_vm0, %v569_v40 }
 0x1cf   : > { %v565_v24 = vadd.f32 %v665_v48, %v546_v20 }
 0x1d1   : > { %573 = vst.msk [vmem:[%s928_s28 + $0x18] sm:$0xff] %vm194_vm0, %v565_v24 }
 0x1d2 PF: > { %s13_s12 = sadd.s32 1, %s688_s12  }
 0x1d3   : > { %p10_p4 = scmp.ge.s32.totalorder %s13_s12, 4  }
 0x1d5   :  { %12 = sbr.rel (!%p10_p4) target bundleno = 1 (0x1), region = 62 }

</bundles_post_ra>
